<compile_context>
chip_gen: v7x
topology: tpu7x:2x2x1
jax: 0.10.0
libtpu: 0.0.40
codegen_flags: <defaults>
</compile_context>

<pallas_src>
import jax
import jax.numpy as jnp
from jax.experimental import pallas as pl
from jax.experimental.pallas import tpu as pltpu


def _vmem_capacity_bytes():
    """Physical VMEM per core; conservative fallback if the query fails."""
    try:
        cap = int(pltpu.get_tpu_info().vmem_capacity_bytes)
        if cap > 0:
            return cap
    except Exception:
        pass
    return 64 << 20  # v7x-sized fallback (safe lower bound for v5e/v6e too)


def _make_chebnet_kernel(Kp1, Bt, N, F_in, F_out_pad, mxu_dtype):
    """Kernel body for K+1 Chebyshev orders over a (Bt, N, *) block."""
    M = Bt * N  # merged matmul M dimension (batch folded into rows)

    def kernel(x_ref, l_ref, w_ref, o_ref):
        # x_ref: (Bt, N, F_in), l_ref: (Bt, N, N) [already in mxu/l dtype],
        # w_ref: ((K+1)*F_in, F_out_pad) [already in mxu dtype],
        # o_ref: (Bt, N, F_out_pad)
        L = l_ref[...]
        if L.dtype != mxu_dtype:          # no-op when wrapper pre-cast L
            L = L.astype(mxu_dtype)

        def proj(xk_m, k):
            # Static slice of the weight ref (zero-cost view), batch merged
            # into rows, f32 accumulate.
            wk = w_ref[k * F_in:(k + 1) * F_in, :]
            return jnp.dot(xk_m.reshape(M, F_in), wk,
                           preferred_element_type=jnp.float32)

        x0 = x_ref[...].astype(jnp.float32)       # f32 carry
        x0_m = x0.astype(mxu_dtype)               # MXU operand copy
        acc = proj(x0_m, 0)                       # T_0 @ x == x

        if Kp1 >= 2:
            x1 = jnp.einsum('bij,bjf->bif', L, x0_m,
                            preferred_element_type=jnp.float32)
            x1_m = x1.astype(mxu_dtype)
            acc = acc + proj(x1_m, 1)
            prev_f32, cur_f32, cur_m = x0, x1, x1_m
            for k in range(2, Kp1):
                lx = jnp.einsum('bij,bjf->bif', L, cur_m,
                                preferred_element_type=jnp.float32)
                nxt = 2.0 * lx - prev_f32          # f32 combine (stable)
                nxt_m = nxt.astype(mxu_dtype)      # single cast per order
                acc = acc + proj(nxt_m, k)
                prev_f32, cur_f32, cur_m = cur_f32, nxt, nxt_m

        o_ref[...] = acc.reshape(Bt, N, F_out_pad).astype(o_ref.dtype)

    return kernel


def chebnet_layer(x, L, weights, *, batch_tile=None,
                  mxu_dtype=jnp.bfloat16, l_dtype=None):
    """x: (B, N, F_in), L: (B, N, N), weights: (K+1, F_in, F_out) -> (B, N, F_out).

    mxu_dtype: dtype of MXU operands (bf16 default; pass jnp.float32 for a
               bit-accurate path).  Carries / combines / accumulation are f32.
    l_dtype:   dtype L is streamed from HBM in (defaults to mxu_dtype) --
               halving the L stream is the dominant win in the HBM-bound regime.
    """
    B, N, F_in = x.shape
    Kp1, F_in_w, F_out = weights.shape
    assert F_in_w == F_in, "weights in_features must match x"
    if l_dtype is None:
        l_dtype = mxu_dtype

    # Lane-dense output only when it's cheap: pad F_out to a multiple of 128
    # only for F_out >= 128 (small outputs: masked stores beat 4x write
    # amplification plus a wrapper-side slice copy).
    if F_out >= 128 and F_out % 128 != 0:
        F_out_pad = ((F_out + 127) // 128) * 128
    else:
        F_out_pad = F_out

    w2d = weights.reshape(Kp1 * F_in, F_out)
    if F_out_pad != F_out:
        w2d = jnp.pad(w2d, ((0, 0), (0, F_out_pad - F_out)))
    if w2d.dtype != mxu_dtype:
        w2d = w2d.astype(mxu_dtype)
    L_in = L if L.dtype == l_dtype else L.astype(l_dtype)

    # --- chip-aware batch-tile selection / VMEM accounting -----------------
    xb = jnp.dtype(x.dtype).itemsize
    lb = jnp.dtype(l_dtype).itemsize
    ob = jnp.dtype(x.dtype).itemsize
    wb = jnp.dtype(mxu_dtype).itemsize

    # Weight block is grid-invariant; it is streamed once but counted with the
    # standard two pipeline buffers.  (For very large weight slabs, single-
    # buffering via pl.Buffered(1) or a one-shot scratch DMA would free VMEM.)
    w_block_bytes = 2 * Kp1 * F_in * F_out_pad * wb
    # Double-buffered in/out blocks + rough in-kernel live values (L value,
    # three f32 carries + one mxu copy, f32 accumulator + output cast).
    per_b_bytes = (2 * (N * F_in * xb + N * N * lb + N * F_out_pad * ob)
                   + N * N * lb
                   + 4 * N * F_in * 4
                   + 2 * N * F_out_pad * 4)

    vmem_cap = _vmem_capacity_bytes()
    if batch_tile is None:
        block_budget = max(per_b_bytes, (vmem_cap * 7) // 16 - w_block_bytes)
        batch_tile = max(1, min(B, block_budget // per_b_bytes))
        if B >= 2:
            # Keep >= 2 grid steps so both v7x TensorCores get work
            # (negligible cost on single-TC v5e/v6e).
            batch_tile = max(1, min(batch_tile, B // 2))
        while B % batch_tile != 0:
            batch_tile -= 1
    Bt = batch_tile
    assert B % Bt == 0
    grid = (B // Bt,)

    footprint = Bt * per_b_bytes + w_block_bytes + (4 << 20)   # + margin
    vmem_limit = int(max(32 << 20, min(footprint, (vmem_cap * 9) // 10)))

    kernel = _make_chebnet_kernel(Kp1, Bt, N, F_in, F_out_pad, mxu_dtype)

    out = pl.pallas_call(
        kernel,
        out_shape=jax.ShapeDtypeStruct((B, N, F_out_pad), x.dtype),
        grid_spec=pltpu.PrefetchScalarGridSpec(
            num_scalar_prefetch=0,
            grid=grid,
            in_specs=[
                pl.BlockSpec((Bt, N, F_in), lambda b: (b, 0, 0)),
                pl.BlockSpec((Bt, N, N), lambda b: (b, 0, 0)),
                pl.BlockSpec((Kp1 * F_in, F_out_pad), lambda b: (0, 0)),
            ],
            out_specs=pl.BlockSpec((Bt, N, F_out_pad), lambda b: (b, 0, 0)),
        ),
        compiler_params=pltpu.CompilerParams(
            dimension_semantics=("parallel",),
            vmem_limit_bytes=vmem_limit),
    )(x, L_in, w2d)

    if F_out_pad != F_out:
        out = out[..., :F_out]
    return out


def chebnet_reference(x, L, weights):
    """Pure-JAX reference mirroring the torch forward exactly."""
    B, N, _ = L.shape
    K = weights.shape[0] - 1
    T = [jnp.broadcast_to(jnp.eye(N, dtype=L.dtype), (B, N, N)), L]
    for _ in range(2, K + 1):
        T.append(2.0 * jnp.einsum('bij,bjk->bik', L, T[-1]) - T[-2])
    x_tilde = jnp.stack([jnp.einsum('bij,bjf->bif', Tk, x) for Tk in T], axis=1)
    return jnp.einsum('bkni,kio->bno', x_tilde, weights)


if __name__ == "__main__":
    B, N, F_in, F_out, K = 2, 16, 8, 32, 3

    key = jax.random.PRNGKey(0)
    kx, kl, kw = jax.random.split(key, 3)

    x = jax.random.normal(kx, (B, N, F_in), dtype=jnp.float32)

    # Build a symmetric rescaled-normalized-Laplacian with spectrum in ~[-1, 1]
    # (L_tilde = L_sym - I), as ChebNet expects.
    A = jax.random.uniform(kl, (B, N, N), dtype=jnp.float32)
    A = 0.5 * (A + jnp.swapaxes(A, -1, -2))
    eye = jnp.eye(N, dtype=jnp.float32)
    A = A * (1.0 - eye)
    d_isqrt = 1.0 / jnp.sqrt(jnp.clip(A.sum(-1), 1e-6))
    L = (eye - d_isqrt[:, :, None] * A * d_isqrt[:, None, :]) - eye

    # Deterministic xavier_normal_-style init for weights (K+1, F_in, F_out).
    fan_in, fan_out = F_in * F_out, (K + 1) * F_out  # torch fan calc for 3-D tensor
    std = (2.0 / (fan_in + fan_out)) ** 0.5
    weights = std * jax.random.normal(kw, (K + 1, F_in, F_out), dtype=jnp.float32)

    ref = chebnet_reference(x, L, weights)

    # Bit-accurate path (f32 MXU operands + f32 L stream): tight tolerance.
    out_f32 = jax.block_until_ready(
        chebnet_layer(x, L, weights, mxu_dtype=jnp.float32))
    assert out_f32.shape == (B, N, F_out)
    assert jnp.allclose(out_f32, ref, atol=1e-4, rtol=1e-4)

    # Fast path (default: bf16 L stream + bf16 MXU operands, f32 accumulate).
    out_bf16 = jax.block_until_ready(chebnet_layer(x, L, weights))
    assert out_bf16.shape == (B, N, F_out)
    rel_err = jnp.linalg.norm(out_bf16 - ref) / jnp.linalg.norm(ref)
    assert float(rel_err) < 5e-2

    print("KERNEL_OK")
</pallas_src>

<mosaic_0001>
module attributes {stable_mosaic.version = 11 : i64} {
  func.func @kernel(%arg0: i32, %arg1: memref<1x16x8xf32, #tpu.memory_space<vmem>>, %arg2: memref<1x16x16xf32, #tpu.memory_space<vmem>>, %arg3: memref<32x32xf32, #tpu.memory_space<vmem>>, %arg4: memref<1x16x32xf32, #tpu.memory_space<vmem>>) attributes {dimension_semantics = [#tpu.dimension_semantics<parallel>], iteration_bounds = array<i64: 2>, scalar_prefetch = 0 : i64, scratch_operands = 0 : i64, tpu.core_type = #tpu.core_type<tc>, window_params = [{transform_indices = @transform_0, window_bounds = array<i64: 1, 16, 8>}, {transform_indices = @transform_1, window_bounds = array<i64: 1, 16, 16>}, {pipeline_mode = #tpu.pipeline_mode<synchronous>, transform_indices = @transform_2, window_bounds = array<i64: 32, 32>}, {transform_indices = @transform_3, window_bounds = array<i64: 1, 16, 32>}]} {
    %c0 = arith.constant 0 : index
    %c0_0 = arith.constant 0 : index
    %c0_1 = arith.constant 0 : index
    %0 = vector.load %arg2[%c0, %c0_0, %c0_1] : memref<1x16x16xf32, #tpu.memory_space<vmem>>, vector<1x16x16xf32>
    %c0_2 = arith.constant 0 : index
    %c0_3 = arith.constant 0 : index
    %c0_4 = arith.constant 0 : index
    %1 = vector.load %arg1[%c0_2, %c0_3, %c0_4] : memref<1x16x8xf32, #tpu.memory_space<vmem>>, vector<1x16x8xf32>
    %c0_5 = arith.constant 0 : index
    %c0_6 = arith.constant 0 : index
    %2 = vector.load %arg3[%c0_5, %c0_6] : memref<32x32xf32, #tpu.memory_space<vmem>>, vector<8x32xf32>
    %3 = vector.shape_cast %1 : vector<1x16x8xf32> to vector<16x8xf32>
    %cst = arith.constant dense<0.000000e+00> : vector<16x32xf32>
    %4 = tpu.matmul %3, %2, %cst {dimension_numbers = #tpu.dot_dimension_numbers<[1], [0], [0], [1], [0, 0, 1, 1], [], []>} : vector<16x8xf32>, vector<8x32xf32>, vector<16x32xf32> -> vector<16x32xf32>
    "tpu.trace_start"() <{level = 10 : i32, message = "bij,bjf->bif"}> : () -> ()
    %cst_7 = arith.constant dense<0.000000e+00> : vector<1x16x8xf32>
    %5 = tpu.matmul %0, %1, %cst_7 {dimension_numbers = #tpu.dot_dimension_numbers<[2], [1], [1], [2], [0, 0, 0, 1, 1, 2], [0], [0]>} : vector<1x16x16xf32>, vector<1x16x8xf32>, vector<1x16x8xf32> -> vector<1x16x8xf32>
    "tpu.trace_stop"() : () -> ()
    %c8 = arith.constant 8 : index
    %c0_8 = arith.constant 0 : index
    %6 = vector.load %arg3[%c8, %c0_8] : memref<32x32xf32, #tpu.memory_space<vmem>>, vector<8x32xf32>
    %7 = vector.shape_cast %5 : vector<1x16x8xf32> to vector<16x8xf32>
    %cst_9 = arith.constant dense<0.000000e+00> : vector<16x32xf32>
    %8 = tpu.matmul %7, %6, %cst_9 {dimension_numbers = #tpu.dot_dimension_numbers<[1], [0], [0], [1], [0, 0, 1, 1], [], []>} : vector<16x8xf32>, vector<8x32xf32>, vector<16x32xf32> -> vector<16x32xf32>
    %9 = arith.addf %4, %8 : vector<16x32xf32>
    "tpu.trace_start"() <{level = 10 : i32, message = "bij,bjf->bif"}> : () -> ()
    %cst_10 = arith.constant dense<0.000000e+00> : vector<1x16x8xf32>
    %10 = tpu.matmul %0, %5, %cst_10 {dimension_numbers = #tpu.dot_dimension_numbers<[2], [1], [1], [2], [0, 0, 0, 1, 1, 2], [0], [0]>} : vector<1x16x16xf32>, vector<1x16x8xf32>, vector<1x16x8xf32> -> vector<1x16x8xf32>
    "tpu.trace_stop"() : () -> ()
    %cst_11 = arith.constant 2.000000e+00 : f32
    %11 = vector.broadcast %cst_11 : f32 to vector<1x16x8xf32>
    %12 = arith.mulf %11, %10 : vector<1x16x8xf32>
    %13 = arith.subf %12, %1 : vector<1x16x8xf32>
    %c16 = arith.constant 16 : index
    %c0_12 = arith.constant 0 : index
    %14 = vector.load %arg3[%c16, %c0_12] : memref<32x32xf32, #tpu.memory_space<vmem>>, vector<8x32xf32>
    %15 = vector.shape_cast %13 : vector<1x16x8xf32> to vector<16x8xf32>
    %cst_13 = arith.constant dense<0.000000e+00> : vector<16x32xf32>
    %16 = tpu.matmul %15, %14, %cst_13 {dimension_numbers = #tpu.dot_dimension_numbers<[1], [0], [0], [1], [0, 0, 1, 1], [], []>} : vector<16x8xf32>, vector<8x32xf32>, vector<16x32xf32> -> vector<16x32xf32>
    %17 = arith.addf %9, %16 : vector<16x32xf32>
    "tpu.trace_start"() <{level = 10 : i32, message = "bij,bjf->bif"}> : () -> ()
    %cst_14 = arith.constant dense<0.000000e+00> : vector<1x16x8xf32>
    %18 = tpu.matmul %0, %13, %cst_14 {dimension_numbers = #tpu.dot_dimension_numbers<[2], [1], [1], [2], [0, 0, 0, 1, 1, 2], [0], [0]>} : vector<1x16x16xf32>, vector<1x16x8xf32>, vector<1x16x8xf32> -> vector<1x16x8xf32>
    "tpu.trace_stop"() : () -> ()
    %cst_15 = arith.constant 2.000000e+00 : f32
    %19 = vector.broadcast %cst_15 : f32 to vector<1x16x8xf32>
    %20 = arith.mulf %19, %18 : vector<1x16x8xf32>
    %21 = arith.subf %20, %5 : vector<1x16x8xf32>
    %c24 = arith.constant 24 : index
    %c0_16 = arith.constant 0 : index
    %22 = vector.load %arg3[%c24, %c0_16] : memref<32x32xf32, #tpu.memory_space<vmem>>, vector<8x32xf32>
    %23 = vector.shape_cast %21 : vector<1x16x8xf32> to vector<16x8xf32>
    %cst_17 = arith.constant dense<0.000000e+00> : vector<16x32xf32>
    %24 = tpu.matmul %23, %22, %cst_17 {dimension_numbers = #tpu.dot_dimension_numbers<[1], [0], [0], [1], [0, 0, 1, 1], [], []>} : vector<16x8xf32>, vector<8x32xf32>, vector<16x32xf32> -> vector<16x32xf32>
    %25 = arith.addf %17, %24 : vector<16x32xf32>
    %26 = vector.shape_cast %25 : vector<16x32xf32> to vector<1x16x32xf32>
    %c0_18 = arith.constant 0 : index
    %c0_19 = arith.constant 0 : index
    %c0_20 = arith.constant 0 : index
    %27 = vector.load %arg4[%c0_18, %c0_19, %c0_20] : memref<1x16x32xf32, #tpu.memory_space<vmem>>, vector<1x16x32xf32>
    tpu.vector_store %arg4[%c0_18, %c0_19, %c0_20], %26 {strides = array<i32>} : memref<1x16x32xf32, #tpu.memory_space<vmem>>, vector<1x16x32xf32>,
    return
  }
  func.func @transform_0(%arg0: i32) -> (i32, i32, i32) {
    %c0_i32 = arith.constant 0 : i32
    %c0_i32_0 = arith.constant 0 : i32
    %c0_i32_1 = arith.constant 0 : i32
    return %arg0, %c0_i32, %c0_i32_0 : i32, i32, i32
  }
  func.func @transform_1(%arg0: i32) -> (i32, i32, i32) {
    %c0_i32 = arith.constant 0 : i32
    %c0_i32_0 = arith.constant 0 : i32
    %c0_i32_1 = arith.constant 0 : i32
    return %arg0, %c0_i32, %c0_i32_0 : i32, i32, i32
  }
  func.func @transform_2(%arg0: i32) -> (i32, i32) {
    %c0_i32 = arith.constant 0 : i32
    %c0_i32_0 = arith.constant 0 : i32
    %c0_i32_1 = arith.constant 0 : i32
    return %c0_i32, %c0_i32_0 : i32, i32
  }
  func.func @transform_3(%arg0: i32) -> (i32, i32, i32) {
    %c0_i32 = arith.constant 0 : i32
    %c0_i32_0 = arith.constant 0 : i32
    %c0_i32_1 = arith.constant 0 : i32
    return %arg0, %c0_i32, %c0_i32_0 : i32, i32, i32
  }
}

</mosaic_0001>

<bundles_post_ra>
// kernel: tpu_custom_call.1
= control target key start
LH: loop header
LB: loop body
LE: loop exit
PB: predicated region body
PF: predicated region fallthrough
CT: control target
= control target key end

     0   :  { %8 = vsyncpa [#allocation3], 0  ;;  %s1331_s0 = inlined_call_operand.vmem [shape: f32[2,16,8], index: 0, kind: input, shape index: {}]   ;;  %s1332_s1 = inlined_call_operand.vmem [shape: f32[2,16,16], index: 1, kind: input, shape index: {}]   ;;  %s1333_s2 = inlined_call_operand.hbm [shape: f32[32,32], index: 2, kind: input, shape index: {}]   ;;  %s1334_s3 = inlined_call_operand.hbm [shape: f32[2,16,32], index: 3, kind: output, shape index: {}]  }
   0x1   :  { %9 = vsyncpa [#allocation4], 0 }
   0x2   :  { %11 = vsyncpa [#allocation4 + $0x1], 0  ;;  %s1176_s12 = smov 0   ;;  %s1178_s13 = smov 0  }
   0x3   :  { %s1180_s14 = smov 0   ;;  %s1182_s15 = smov 0  }
   0x4 LB: > { %s1197_s16 = sadd.s32 4294967295, %s1148_s15   ;;  %s884_s17 = sadd.s32 4294967294, %s1148_s15   ;;  %s1148_s15 = sphi %s1182_s15, %s1350_s15   ;;  %s1144_s14 = sphi %s1180_s14, %s1349_s14   ;;  %s1140_s13 = sphi %s1178_s13, %s1348_s13   ;;  %s1136_s12 = sphi %s1176_s12, %s1347_s12  }
   0x5   : > { %s1201_s18 = sadd.s32 1, %s1148_s15   ;;  %s97_s19 = sadd.s32 1, %s1144_s14 }
   0x6   : > { %s94_s20 = ssub.s32 %s1148_s15, %s1201_s18  ;;  %p107_p0 = scmp.ne.s32.totalorder %s1144_s14, %s1140_s13 }
   0x7   : > { %p95_p1 = scmp.eq.s32.totalorder %s94_s20, 0  ;;  %p108_p2 = scmp.eq.s32.totalorder %s1197_s16, 1 }
   0x8   : > { %p113_p3 = scmp.ne.s32.totalorder %s1140_s13, %s1136_s12  ;;  %p114_p4 = scmp.eq.s32.totalorder %s884_s17, 1 }
   0x9   : > { %s1212_s21 = scalar_select %p95_p1, %s1144_s14, %s97_s19  }
   0xa   : > { %p1214_p5 = por %p108_p2, %p107_p0  ;;  %p1218_p6 = por %p114_p4, %p113_p3 }
   0xb   : > { %p885_p7 = scmp.ge.s32.totalorder %s1148_s15, 1  ;;  %p121_p8 = scmp.lt.s32.totalorder %s1148_s15, 3 }
   0xc   : > { %s1338_s22 = scalar_select %p1214_p5, 1, 0 }
   0xd   : > { %s1339_s23 = scalar_select %p1218_p6, 1, 0 }
   0xe   : > { %p1335_p9 = scmp.eq.s32.totalorder %s1197_s16, 0  ;;  %p1225_p10 = pnand %p885_p7, %p121_p8 }
   0xf   : > { %s1150_s25 = smov [#allocation2]   ;;  %s1054_s30 = scalar_lea.hbm %s1333_s2, 512 }
  0x10   : > { %s1340_s24 = scalar_select %p1225_p10, 1, 0 }
  0x11   : > { %s133_s26 = sshll.u32 %s1150_s25, 4  ;;  %p1006_p11 = pneg %p1225_p10  ;;  %s134_s26 = int_to_ptr.vmem [resolvable:$true] %s133_s26 }
  0x12   : > { %p1055_p13 = scmp.ne.s32.totalorder %s1333_s2, %s1054_s30  ;;  %p1061_p3 = scmp.lt.u32.totalorder %s1054_s30, %s1333_s2 }
  0x13   : > { %p1233_p12 = pnand %p1335_p9, %p1006_p11 }
  0x15   : > { %p1056_p0 = pneg %p1233_p12 }
  0x17   : > { %p1057_p1 = pnand %p1056_p0, %p1055_p13 }
  0x19   : > { %p1058_p2 = pneg %p1057_p1 }
  0x1b   : > { %p1063_p4 = pnand %p1061_p3, %p1058_p2 }
  0x1d   : > { %1066 = shalt.err (!%p1063_p4)
}
  0x1e   : > { %s1067_s8 = scalar_lea.vmem %s134_s26, 512  ;;  %p1075_p9 = scmp.lt.s32.totalorder %s134_s26, %s134_s26 }
  0x1f   : > { %p1068_p7 = scmp.ne.s32.totalorder %s134_s26, %s1067_s8  ;;  %p1076_p6 = scmp.lt.s32.totalorder %s1067_s8, %s1067_s8 }
  0x21   : > { %p1070_p8 = pnand %p1068_p7, %p1056_p0  ;;  %p1077_p5 = por %p1076_p6, %p1075_p9 }
  0x23   : > { %p1071_p11 = pneg %p1070_p8 }
  0x25   : > { %p1078_p10 = pnand %p1077_p5, %p1071_p11 }
  0x27   : > { %1081 = shalt.err (!%p1078_p10)
}
  0x28   : > { %s1151_s9 = smov 128   ;;  %s1152_s10 = smov 8  }
  0x29   : > { %1009 = dma.hbm_to_vmem [thread:$0]  (!%p1233_p12), %s1333_s2, 512, %s134_s26, [#allocation3], %s1151_s9, %s1151_s9, %s1152_s10  }
  0x2a   : > { %p1342_p13 = scmp.ne.s32.totalorder %s1340_s24, 0 }
  0x2b   : > { %p1343_p1 = scmp.eq.s32.totalorder (!%p1342_p13), %s1197_s16, 0 }
  0x2c   : > { %165 = sbr.rel (%p1342_p13) target bundleno = 953 (0x3b9), region = 32 }
  0x33   : > { %1127 = dma.done.wait (%p1343_p1), [#allocation3], 512   ;;  %p1344_p0 = pmov %p1343_p1 }
  0x34   : > { %p194_p5 = scmp.lt.s32.totalorder %s1197_s16, 1  ;;  %vm209_vm0 = vcmask 130048   ;;  %v291_v5 = vld [vmem:[#allocation2 + $0x8] sm:$0xff]  ;;  %v208_v6 = vld [vmem:[#allocation2] sm:$0xff]  ;;  %vm292_vm1 = vcmask 64512   ;;  %v534_v10 = vld [vmem:[#allocation2 + $0x10] sm:$0xff] }
  0x35   : > { %1129 = vsyncadd (%p1344_p0), [#allocation3], 4294966784  ;;  %948 = vmatprep.subr.mxu1 %v291_v5  ;;  %v697_v11 = vld [vmem:[#allocation2 + $0x18] sm:$0xff]  ;;  %s191_s30 = sand.u32 1, %s1140_s13   ;;  %s916_s7 = sshll.u32 %s1197_s16, 8  ;;  %vm781_vm2 = vcmask 261120  }
  0x36   : > { %s195_s19 = scalar_select %p194_p5, %s1197_s16, 1  ;;  %949 = vmatpush3.msra.mxu1 %v291_v5 }
  0x37   : > { %953 = vmatprep.subr.mxu1 %v208_v6  ;;  %s890_s4 = sshll.u32 %s191_s30, 4  ;;  %s1288_s10 = scalar_lea.hbm %s1334_s3, %s916_s7 }
  0x38   : > { %s914_s20 = sshll.u32 %s195_s19, 4  ;;  %s193_s5 = scalar_lea.vmem [#allocation5], %s890_s4 }
  0x39   : > { %s198_s28 = scalar_lea.vmem %s1331_s0, %s914_s20  ;;  %s203_s24 = scalar_lea.vmem %s1332_s1, %s914_s20 }
  0x3a   : > { %v206_v0 = vld [vmem:[%s198_s28] sm:$0xff]  ;;  %v207_v1 = vld [vmem:[%s198_s28 + $0x8] sm:$0xff]  ;;  %s798_s6 = sshll.u32 %s193_s5, 4  ;;  %s1290_s11 = scalar_lea.sflag [#allocation4], %s191_s30  ;;  %s1283_s6 = int_to_ptr.vmem [resolvable:$true] %s798_s6 }
  0x3b   : > { %v204_v2 = vld [vmem:[%s203_s24] sm:$0xff]  ;;  %v982_v3 = vpack.c.bf16 %v207_v1, %v206_v0  ;;  %v205_v4 = vld [vmem:[%s203_s24 + $0x8] sm:$0xff]  ;;  %s1082_s17 = scalar_lea.vmem %s1283_s6, 256  ;;  %p1345_p9 = scmp.ne.s32.totalorder %s1338_s22, 0 }
  0x3c   : > { %945 = vmatprep.mubr.msk.f32.mxu0 %vm209_vm0, %v204_v2  ;;  %p1083_p6 = scmp.ne.s32.totalorder %s1283_s6, %s1082_s17  ;;  %s1153_s16 = smov [#allocation5]  }
  0x3d   : > { %983 = vmatprep.subr.bf16.mxu0 %v982_v3  ;;  %s1086_s19 = sshll.u32 %s1153_s16, 4  ;;  %s1087_s19 = int_to_ptr.vmem [resolvable:$false] %s1086_s19 }
  0x3e   : > { %985 = vmatpush3.bf16.msra.mxu0 %v982_v3  ;;  %p1084_p10 = pnand %p1083_p6, %p1345_p9  ;;  %s1088_s20 = scalar_lea.vmem %s1087_s19, 512 }
  0x3f   : > { %p1089_p2 = scmp.lt.s32.totalorder %s1283_s6, %s1087_s19  ;;  %p1090_p3 = scmp.lt.s32.totalorder %s1088_s20, %s1082_s17 }
  0x40   : > { %p1085_p12 = pneg %p1084_p10 }
  0x41   : > { %946 = vmatmul.mubr.msk.f32.vlgmr.msra.gmra.mrb[0].mxu0 %vm209_vm0, %v205_v4  ;;  %p1091_p4 = por %p1090_p3, %p1089_p2 }
  0x42   : > { %962 = vmatprep.mubr.msk.f32.mxu0 %vm209_vm0, %v204_v2 }
  0x43   : > { %p1092_p7 = pnand %p1091_p4, %p1085_p12 }
 0x114   : > { %v947_v7 = vpop.f32.mrb[0].mxu0 }
 0x115   : > { %v282_v8 = vpop.f32.mrb[1].mxu0 }
 0x116   : > { %v986_v9 = vpack.c.bf16 %v947_v7, %v282_v8  ;;  %950 = vmatprep.mubr.msk.f32.mxu1 %vm292_vm1, %v282_v8 }
 0x117   : > { %951 = vmatmul.mubr.msk.f32.vlgmr.msra.gmra.mrb[0].mxu1 %vm292_vm1, %v947_v7 }
 0x118   : > { %987 = vmatprep.subr.bf16.mxu0 %v986_v9  ;;  %954 = vmatpush3.msra.mxu1 %v208_v6 }
 0x119   : > { %989 = vmatpush3.bf16.msra.mxu0 %v986_v9  ;;  %955 = vmatprep.mubr.msk.f32.mxu1 %vm292_vm1, %v206_v0 }
 0x11a   : > { %965 = vmatprep.subr.mxu1 %v534_v10 }
 0x11c   : > { %963 = vmatmul.mubr.msk.f32.vlgmr.msra.gmra.mrb[2].mxu0 %vm209_vm0, %v205_v4 }
 0x11d   : > { %974 = vmatprep.mubr.msk.f32.mxu0 %vm209_vm0, %v204_v2 }
 0x11f   : > { %956 = vmatmul.mubr.msk.f32.vlgmr.msra.gmra.mrb[0].mxu1 %vm292_vm1, %v207_v1 }
 0x120   : > { %966 = vmatpush3.msra.mxu1 %v534_v10 }
 0x121   : > { %977 = vmatprep.subr.mxu1 %v697_v11 }
 0x1ef   : > { %v964_v12 = vpop.f32.mrb[2].mxu0 }
 0x1f0   : > { %v531_v13 = vmul.f32 2.0, %v964_v12  ;;  %v521_v14 = vpop.f32.mrb[3].mxu0 }
 0x1f1   : > { %v530_v15 = vmul.f32 2.0, %v521_v14 }
 0x1f2   : > { %v533_v16 = vsub.f32 %v531_v13, %v207_v1 }
 0x1f3   : > { %v532_v17 = vsub.f32 %v530_v15, %v206_v0 }
 0x1f5   : > { %967 = vmatprep.mubr.msk.f32.mxu1 %vm292_vm1, %v532_v17  ;;  %v990_v18 = vpack.c.bf16 %v533_v16, %v532_v17 }
 0x1f6   : > { %968 = vmatmul.mubr.msk.f32.vlgmr.msra.gmra.mrb[0].mxu1 %vm292_vm1, %v533_v16 }
 0x1f7   : > { %991 = vmatprep.subr.bf16.mxu0 %v990_v18  ;;  %978 = vmatpush3.msra.mxu1 %v697_v11 }
 0x1f8   : > { %993 = vmatpush3.bf16.msra.mxu0 %v990_v18 }
 0x1fb   : > { %975 = vmatmul.mubr.msk.f32.vlgmr.msra.gmra.mrb[4].mxu0 %vm209_vm0, %v205_v4 }
 0x2ce   : > { %v976_v19 = vpop.f32.mrb[4].mxu0 }
 0x2cf   : > { %v694_v20 = vmul.f32 2.0, %v976_v19  ;;  %v684_v21 = vpop.f32.mrb[5].mxu0 }
 0x2d0   : > { %v693_v22 = vmul.f32 2.0, %v684_v21 }
 0x2d1   : > { %v696_v23 = vsub.f32 %v694_v20, %v947_v7 }
 0x2d2   : > { %v695_v24 = vsub.f32 %v693_v22, %v282_v8 }
 0x2d4   : > { %979 = vmatprep.mubr.msk.f32.mxu1 %vm292_vm1, %v695_v24 }
 0x2d5   : > { %980 = vmatmul.mubr.msk.f32.vlgmr.msra.gmra.mrb[0].mxu1 %vm292_vm1, %v696_v23 }
 0x3a8   : > { %v981_v25 = vpop.f32.mrb[0].mxu1 }
 0x3a9   : > { %783 = vst.msk [vmem:[%s193_s5 + $0x8] sm:$0xff] %vm781_vm2, %v981_v25  ;;  %v770_v26 = vpop.f32.mrb[1].mxu1 }
 0x3aa   : > { %782 = vst.msk [vmem:[%s193_s5] sm:$0xff] %vm781_vm2, %v770_v26 }
 0x3ab   : > { %1095 = shalt.err (!%p1092_p7)
}
 0x3ac   : > { %s1096_s25 = scalar_lea.hbm %s1288_s10, 256  ;;  %s1100_s29 = scalar_lea.hbm %s1334_s3, 512 }
 0x3ad   : > { %p1097_p8 = scmp.ne.s32.totalorder %s1288_s10, %s1096_s25  ;;  %p1101_p1 = scmp.lt.u32.totalorder %s1288_s10, %s1334_s3 }
 0x3ae   : > { %p1102_p0 = scmp.lt.u32.totalorder %s1100_s29, %s1096_s25  ;;  %p1104_p6 = scmp.lt.u32.totalorder %s1096_s25, %s1288_s10 }
 0x3af   : > { %p1098_p11 = pnand %p1097_p8, %p1345_p9 }
 0x3b0   : > { %p1103_p5 = por %p1102_p0, %p1101_p1 }
 0x3b1   : > { %p1099_p13 = pneg %p1098_p11 }
 0x3b2   : > { %p1105_p10 = por %p1104_p6, %p1103_p5 }
 0x3b4   : > { %p1106_p12 = pnand %p1105_p10, %p1099_p13 }
 0x3b6   : > { %1109 = shalt.err (!%p1106_p12)
}
 0x3b7   : > { %s1154_s30 = smov 128   ;;  %s1155_s4 = smov 8  }
 0x3b8   : > { %1004 = dma.vmem_to_hbm [thread:$0]  (%p1345_p9), %s1283_s6, 256, %s1288_s10, %s1290_s11, %s1154_s30, %s1154_s30, %s1155_s4  }
 0x3b9 PF: > { %p1016_p2 = scmp.ge.s32.totalorder %s1148_s15, 2  ;;  %s813_s5 = sand.u32 1, %s1136_s12  }
 0x3ba   : > { %p1346_p3 = scmp.ne.s32.totalorder %s1339_s23, 0  ;;  %s814_s7 = scalar_lea.sflag [#allocation4], %s813_s5 }
 0x3bc   : > { %p1011_p4 = pnand %p1016_p2, %p1346_p3 }
 0x3be   : > { %1131 = dma.done.wait (!%p1011_p4), %s814_s7, 256  }
 0x3bf   : > { %1133 = vsyncadd (!%p1011_p4), %s814_s7, 4294967040  ;;  %p14_p7 = scmp.ge.s32.totalorder %s1201_s18, 4   ;;  %s1347_s12 = smov %s1140_s13 }
 0x3c0   : > { %s1348_s13 = smov %s1144_s14  ;;  %s1349_s14 = smov %s1212_s21 }
 0x3c1   : > { %s1350_s15 = smov %s1201_s18  ;;  %16 = sbr.rel (!%p14_p7) target bundleno = 4 (0x4), region = 75 }
 0x3c8   :  { %819 = vsyncpa [#allocation3], 1 }
 0x3c9   :  { %821 = vsyncpa [#allocation3 + $0x1], 1 }
 0x3ca   :  { %822 = vsyncpa [#allocation4], 1 }
 0x3cb   :  { %824 = vsyncpa [#allocation4 + $0x1], 1 }

</bundles_post_ra>
